<compile_context>
chip_gen: v6e
topology: v6e:2x2x1
jax: 0.10.0
libtpu: 0.0.40
codegen_flags: <defaults>
</compile_context>

<pallas_src>
import functools

import jax
import jax.numpy as jnp
from jax.experimental import pallas as pl
from jax.experimental.pallas import tpu as pltpu

LANE = 128
SUBLANE = 8


def _swish_kernel(x_ref, o_ref, *, beta):
    # Compute in f32 regardless of I/O dtype.
    x = x_ref[...].astype(jnp.float32)
    # exp goes to the EUP slot; the reciprocal is exact (plain divide) so the
    # result matches the f32 reference bit-for-bit. This op is memory-bound on
    # every TPU generation, so the VALU/EUP work is hidden under DMA anyway.
    sig = pl.reciprocal(1.0 + jnp.exp(-beta * x), approx=False)
    o_ref[...] = (x * sig).astype(o_ref.dtype)


@functools.lru_cache(maxsize=1)
def _min_grid_programs():
    """>= 2 pipelined grid steps per TensorCore on 2-TC chips; 1 elsewhere."""
    try:
        kind = jax.devices()[0].device_kind.lower()
    except Exception:  # pragma: no cover - defensive only
        return 1
    if "v7" in kind or "7x" in kind:
        return 4  # 2 TensorCores x 2 pipelined steps each
    return 1  # v5e / v6e: single TensorCore, don't add grid steps


def _choose_block_rows(rows, itemsize, tile_byte_budget):
    """Pick block rows for a (rows, LANE) slab of `itemsize`-byte elements."""
    # Sublane quantum of the packed dtype: 8 rows (f32), 16 (bf16/f16), 32 (1B).
    quantum = max(SUBLANE, 32 // itemsize)
    budget_rows = max(
        quantum, (tile_byte_budget // (LANE * itemsize)) // quantum * quantum
    )
    if rows <= budget_rows:
        br = rows  # single full-extent block (exempt from the /8 rule)
    else:
        br = budget_rows  # quantum-aligned; last block may be partial
    # On chips with two TensorCores, give each core >= 2 pipelined steps so
    # block i's writeback overlaps block i+1's fetch.
    target = _min_grid_programs()
    if target > 1 and rows >= target * quantum and pl.cdiv(rows, br) < target:
        br = max(quantum, (rows // target) // quantum * quantum)
    return br


def _swish_2d(x2d, beta, tile_byte_budget):
    """Swish on a lane-dense (rows, 128) slab via Pallas."""
    rows, lanes = x2d.shape
    assert lanes == LANE
    itemsize = jnp.dtype(x2d.dtype).itemsize
    br = _choose_block_rows(rows, itemsize, tile_byte_budget)
    grid = (pl.cdiv(rows, br),)

    # VMEM budget: 2 pipeline buffers each for input and output, plus room for
    # f32 compute temporaries and Mosaic scratch. Clamped well under v7x's
    # 64 MiB physical VMEM (v5e/v6e have 128 MiB, so this always fits there).
    tile_bytes = br * LANE * itemsize
    tile_f32_bytes = br * LANE * 4
    vmem_limit = int(min(4 * tile_bytes + 3 * tile_f32_bytes + (4 << 20), 56 << 20))

    n_elems = rows * LANE
    cost = pl.CostEstimate(
        flops=5 * n_elems,
        transcendentals=n_elems,
        bytes_accessed=2 * n_elems * itemsize,
    )

    return pl.pallas_call(
        functools.partial(_swish_kernel, beta=float(beta)),
        out_shape=jax.ShapeDtypeStruct((rows, LANE), x2d.dtype),
        grid_spec=pltpu.PrefetchScalarGridSpec(
            num_scalar_prefetch=0,
            grid=grid,
            in_specs=[pl.BlockSpec((br, LANE), lambda i: (i, 0))],
            out_specs=pl.BlockSpec((br, LANE), lambda i: (i, 0)),
        ),
        compiler_params=pltpu.CompilerParams(
            dimension_semantics=("parallel",),
            vmem_limit_bytes=vmem_limit,
        ),
        cost_estimate=cost,
    )(x2d)


def _swish_xla(x, beta):
    """Plain-XLA Swish for the tiny (<128-element) lane tail."""
    xf = x.astype(jnp.float32)
    return (xf * (1.0 / (1.0 + jnp.exp(-beta * xf)))).astype(x.dtype)


def swish(x, beta=1.0, *, tile_byte_budget=4 << 20):
    """Elementwise Swish via Pallas. Accepts any shape / float dtype."""
    orig_shape = x.shape
    n = x.size
    if n == 0:
        return x
    flat = jnp.reshape(x, (-1,))
    n_main = (n // LANE) * LANE

    if n_main == n:
        # Fast path: zero-copy reshape, everything through Pallas.
        out2d = _swish_2d(jnp.reshape(flat, (n // LANE, LANE)), beta, tile_byte_budget)
        return jnp.reshape(out2d, orig_shape)

    if n_main == 0:
        # Fewer than 128 elements: not worth a kernel launch.
        return jnp.reshape(_swish_xla(flat, beta), orig_shape)

    # Ragged size: Pallas on the lane-aligned prefix, XLA on the <128-element
    # tail. Avoids the previous full-tensor zero-pad concatenate + full-output
    # un-slice on this path.
    # TODO(synk): mask the tail inside the kernel (scalar-prefetched length +
    # masked store) to make the ragged path fully copy-free as well.
    main = jax.lax.slice(flat, (0,), (n_main,))
    tail = jax.lax.slice(flat, (n_main,), (n,))
    main_out = _swish_2d(
        jnp.reshape(main, (n_main // LANE, LANE)), beta, tile_byte_budget
    )
    out_flat = jnp.concatenate([jnp.reshape(main_out, (-1,)), _swish_xla(tail, beta)])
    return jnp.reshape(out_flat, orig_shape)


def swish_ref(x, beta=1.0):
    xf = x.astype(jnp.float32)
    sigmoid = 1.0 / (1.0 + jnp.exp(-beta * xf))
    return (xf * sigmoid).astype(x.dtype)


if __name__ == "__main__":
    key = jax.random.PRNGKey(0)
    beta = 1.0
    k0, k1, k2, k3 = jax.random.split(key, 4)

    # NCHW-style input (batch=2, channels=4, spatial=16x16) -> 2048 elements,
    # lane-aligned fast path.
    x = jax.random.normal(k0, (2, 4, 16, 16), dtype=jnp.float32)
    out = jax.block_until_ready(swish(x, beta=beta))
    assert out.shape == x.shape and out.dtype == x.dtype
    assert jnp.allclose(out, swish_ref(x, beta=beta), atol=1e-6, rtol=1e-6)

    # Odd-sized input (105 elements) -> tiny pure-XLA path.
    x_odd = jax.random.normal(k1, (3, 5, 7), dtype=jnp.float32)
    out_odd = jax.block_until_ready(swish(x_odd, beta=beta))
    assert out_odd.shape == x_odd.shape
    assert jnp.allclose(out_odd, swish_ref(x_odd, beta=beta), atol=1e-6, rtol=1e-6)

    # Ragged but >128 elements (5*50 = 250) -> Pallas prefix + XLA tail.
    x_rag = jax.random.normal(k2, (5, 50), dtype=jnp.float32)
    out_rag = jax.block_until_ready(swish(x_rag, beta=beta))
    assert out_rag.shape == x_rag.shape
    assert jnp.allclose(out_rag, swish_ref(x_rag, beta=beta), atol=1e-6, rtol=1e-6)

    # bf16 input -> exercises the dtype-dependent quantum + in-kernel f32 math.
    x_bf = jax.random.normal(k3, (64, 128), dtype=jnp.bfloat16)
    out_bf = jax.block_until_ready(swish(x_bf, beta=beta))
    assert out_bf.shape == x_bf.shape and out_bf.dtype == jnp.bfloat16
    assert jnp.allclose(
        out_bf.astype(jnp.float32),
        swish_ref(x_bf, beta=beta).astype(jnp.float32),
        atol=2e-2,
        rtol=2e-2,
    )

    print("KERNEL_OK")
</pallas_src>

<mosaic_0001>
module attributes {stable_mosaic.version = 11 : i64} {
  func.func @_swish_kernel(%arg0: i32, %arg1: memref<16x128xf32, #tpu.memory_space<vmem>>, %arg2: memref<16x128xf32, #tpu.memory_space<vmem>>) attributes {dimension_semantics = [#tpu.dimension_semantics<parallel>], iteration_bounds = array<i64: 1>, scalar_prefetch = 0 : i64, scratch_operands = 0 : i64, tpu.core_type = #tpu.core_type<tc>, window_params = [{transform_indices = @transform_0, window_bounds = array<i64: 16, 128>}, {transform_indices = @transform_1, window_bounds = array<i64: 16, 128>}]} {
    %c0 = arith.constant 0 : index
    %c0_0 = arith.constant 0 : index
    %0 = vector.load %arg1[%c0, %c0_0] : memref<16x128xf32, #tpu.memory_space<vmem>>, vector<16x128xf32>
    %cst = arith.constant -1.000000e+00 : f32
    %1 = vector.broadcast %cst : f32 to vector<16x128xf32>
    %2 = arith.mulf %1, %0 : vector<16x128xf32>
    %3 = math.exp %2 : vector<16x128xf32>
    %cst_1 = arith.constant 1.000000e+00 : f32
    %4 = vector.broadcast %cst_1 : f32 to vector<16x128xf32>
    %5 = arith.addf %4, %3 : vector<16x128xf32>
    %6 = tpu.reciprocal %5 : vector<16x128xf32> -> vector<16x128xf32>
    %7 = arith.mulf %0, %6 : vector<16x128xf32>
    %c0_2 = arith.constant 0 : index
    %c0_3 = arith.constant 0 : index
    %8 = vector.load %arg2[%c0_2, %c0_3] : memref<16x128xf32, #tpu.memory_space<vmem>>, vector<16x128xf32>
    tpu.vector_store %arg2[%c0_2, %c0_3], %7 {strides = array<i32>} : memref<16x128xf32, #tpu.memory_space<vmem>>, vector<16x128xf32>,
    return
  }
  func.func @transform_0(%arg0: i32) -> (i32, i32) {
    %c0_i32 = arith.constant 0 : i32
    %c0_i32_0 = arith.constant 0 : i32
    return %arg0, %c0_i32 : i32, i32
  }
  func.func @transform_1(%arg0: i32) -> (i32, i32) {
    %c0_i32 = arith.constant 0 : i32
    %c0_i32_0 = arith.constant 0 : i32
    return %arg0, %c0_i32 : i32, i32
  }
}

</mosaic_0001>

<bundles_post_ra>
// kernel: tpu_custom_call.1
= control target key start
LH: loop header
LB: loop body
LE: loop exit
PB: predicated region body
PF: predicated region fallthrough
CT: control target
= control target key end

     0   :  { %6 = vsyncpa [#allocation3], 0  ;;  %s138_s0 = inlined_call_operand.hbm [shape: f32[16,128], index: 0, kind: input, shape index: {}]   ;;  %s139_s1 = inlined_call_operand.hbm [shape: f32[16,128], index: 1, kind: output, shape index: {}]  }
   0x1   :  { %7 = vsyncpa [#allocation4], 0  ;;  %s112_s6 = smov [#allocation2]  }
   0x2   :  { %s13_s7 = sshll.u32 %s112_s6, 4  ;;  %s14_s7 = int_to_ptr.vmem [resolvable:$true] %s13_s7 }
   0x3   :  { %s76_s8 = scalar_lea.vmem %s14_s7, 256  ;;  %p81_p1 = scmp.lt.s32.totalorder %s14_s7, %s14_s7 }
   0x4   :  { %p77_p0 = scmp.ne.s32.totalorder %s14_s7, %s76_s8  ;;  %p82_p2 = scmp.lt.s32.totalorder %s76_s8, %s76_s8 }
   0x6   :  { %p83_p3 = por %p82_p2, %p81_p1 }
   0x8   :  { %p84_p4 = pnand %p83_p3, %p77_p0 }
   0xa   :  { %87 = shalt.err (!%p84_p4)
}
   0xb   :  { %s113_s9 = smov 128   ;;  %s114_s10 = smov 8  }
   0xc   :  { %19 = dma.hbm_to_vmem [thread:$0]  %s138_s0, 256, %s14_s7, [#allocation3], %s113_s9, %s113_s9, %s114_s10  }
   0xd   :  { %108 = dma.done.wait [#allocation3], 256  }
   0xe   :  { %109 = vsyncadd [#allocation3], 4294967040  ;;  %v23_v0 = vld [vmem:[#allocation2] sm:$0xff]  ;;  %v24_v1 = vld [vmem:[#allocation2 + $0x8] sm:$0xff]  ;;  %s115_s13 = smov [#allocation5]  }
   0xf   :  { %v25_v2 = vmul.f32 -1.0, %v23_v0  ;;  %v26_v3 = vmul.f32 -1.0, %v24_v1  ;;  %s44_s14 = sshll.u32 %s115_s13, 4  ;;  %s45_s14 = int_to_ptr.vmem [resolvable:$true] %s44_s14 }
  0x10   :  { %s88_s0 = scalar_lea.vmem %s45_s14, 256  ;;  %p93_p6 = scmp.lt.s32.totalorder %s45_s14, %s45_s14 }
  0x11   :  { %v27_v4 = vmul.f32 1.442695, %v25_v2  ;;  %v29_v5 = vmul.f32 1.442695, %v26_v3  ;;  %p89_p5 = scmp.ne.s32.totalorder %s45_s14, %s88_s0  ;;  %p94_p7 = scmp.lt.s32.totalorder %s88_s0, %s88_s0 }
  0x13   :  { %60 = vpow2.f32 %v27_v4  ;;  %p95_p8 = por %p94_p7, %p93_p6 }
  0x14   :  { %62 = vpow2.f32 %v29_v5 }
  0x15   :  { %p96_p9 = pnand %p95_p8, %p89_p5 }
  0x20   :  { %v61_v6 = vpop.eup %60 }
  0x21   :  { %v63_v7 = vpop.eup %62  ;;  %v31_v8 = vadd.f32 1.0, %v61_v6 }
  0x22   :  { %v32_v9 = vadd.f32 1.0, %v63_v7 }
  0x23   :  { %64 = vrcp.f32 %v31_v8 }
  0x24   :  { %66 = vrcp.f32 %v32_v9 }
  0x30   :  { %v65_v10 = vpop.eup %64 }
  0x31   :  { %v67_v11 = vpop.eup %66  ;;  %v35_v12 = vmul.f32 %v65_v10, %v23_v0 }
  0x32   :  { %v36_v13 = vmul.f32 %v67_v11, %v24_v1 }
  0x33   :  { %37 = vst [vmem:[#allocation5] sm:$0xff] %v35_v12 }
  0x34   :  { %38 = vst [vmem:[#allocation5 + $0x8] sm:$0xff] %v36_v13 }
  0x35   :  { %99 = shalt.err (!%p96_p9)
}
  0x36   :  { %50 = dma.vmem_to_hbm [thread:$0]  %s45_s14, 256, %s139_s1, [#allocation4], %s113_s9, %s113_s9, %s114_s10  }
  0x37   :  { %110 = dma.done.wait [#allocation4], 256  }
  0x38   :  { %111 = vsyncadd [#allocation4], 4294967040 }
  0x39   :  { %54 = vsyncpa [#allocation3], 1 }
  0x3a   :  { %55 = vsyncpa [#allocation4], 1 }

</bundles_post_ra>
